<compile_context>
chip_gen: v5e
topology: v5e:2x2
jax: 0.10.0
libtpu: 0.0.40
codegen_flags: <defaults>
</compile_context>

<pallas_src>
import jax
import jax.numpy as jnp
from jax.experimental import pallas as pl
from jax.experimental.pallas import tpu as pltpu


OUT_W = 128  # lane-dense output slab width (multiple of 128)


def _policy_kernel(x_ref, w1_ref, b1_ref, wout_ref, bout_ref, out_ref):
    """Fused Actor._forward (tanh MLP layer) + packed policy scoring head.

    out = [ft | scores | 0] where ft = tanh(x @ W1 + b1), scores = ft @ W2 + b2,
    realized as a single dense (dim, 128) matmul with W_out = [eye | W2 | 0].
    """
    ft = jnp.tanh(
        jnp.dot(x_ref[...], w1_ref[...], preferred_element_type=jnp.float32)
        + b1_ref[...]
    )  # (B, dim)
    out_ref[...] = (
        jnp.dot(ft, wout_ref[...], preferred_element_type=jnp.float32)
        + bout_ref[...]
    ).astype(out_ref.dtype)  # (B, OUT_W) -- one unmasked full-width store


def policy_forward(att_feats, w1, b1, w2, b2):
    """Batched fused Policy.forward.

    att_feats : list of (B, d_att) f32 arrays (one per attention module)
    w1 : (D_in, dim), b1 : (1, dim), w2 : (dim, n_actions), b2 : (1, n_actions)

    Returns (slab, dim, n_actions) where slab is (B, 128) f32 with
    ft = slab[:, :dim] and scores = slab[:, dim:dim+n_actions].  Downstream
    consumers should read the packed slab directly to avoid re-slicing copies.
    """
    n_att = len(att_feats)
    B, d_att = att_feats[0].shape
    d_in, dim = w1.shape
    n_actions = w2.shape[1]
    assert d_in == n_att * d_att
    assert B % 8 == 0, "batch (stacked steps/envs) must be a sublane multiple"
    pad_w = OUT_W - dim - n_actions
    assert pad_w >= 0, "dim + n_actions must fit in one 128-lane slab"

    # Host-side prep: one cheap concat of the attention features, and fold the
    # {ft, scores} slab packing into the head weights (constant per call).
    x = jnp.concatenate(att_feats, axis=-1)  # (B, d_in)
    w_out = jnp.concatenate(
        [jnp.eye(dim, dtype=jnp.float32), w2,
         jnp.zeros((dim, pad_w), jnp.float32)], axis=1)              # (dim, OUT_W)
    b_out = jnp.concatenate(
        [jnp.zeros((1, dim), jnp.float32), b2,
         jnp.zeros((1, pad_w), jnp.float32)], axis=1)                # (1, OUT_W)

    flops = 2 * B * (d_in * dim + dim * OUT_W)
    bytes_accessed = 4 * (
        B * d_in + d_in * dim + dim + dim * OUT_W + OUT_W + B * OUT_W
    )
    cost = pl.CostEstimate(
        flops=flops, transcendentals=B * dim, bytes_accessed=bytes_accessed
    )

    # Single grid step: whole batch + weights resident in VMEM (tiny footprint
    # at these shapes). For very large rollouts, add a batch/timestep grid axis
    # with the weight index_maps kept at (0, 0).
    slab = pl.pallas_call(
        _policy_kernel,
        out_shape=jax.ShapeDtypeStruct((B, OUT_W), jnp.float32),
        grid_spec=pltpu.PrefetchScalarGridSpec(
            num_scalar_prefetch=0,
            grid=(1,),
            in_specs=[
                pl.BlockSpec((B, d_in), lambda i: (0, 0)),     # activations
                pl.BlockSpec((d_in, dim), lambda i: (0, 0)),   # W1
                pl.BlockSpec((1, dim), lambda i: (0, 0)),      # b1
                pl.BlockSpec((dim, OUT_W), lambda i: (0, 0)),  # [eye | W2 | 0]
                pl.BlockSpec((1, OUT_W), lambda i: (0, 0)),    # [0 | b2 | 0]
            ],
            out_specs=pl.BlockSpec((B, OUT_W), lambda i: (0, 0)),
        ),
        compiler_params=pltpu.CompilerParams(
            dimension_semantics=("arbitrary",),
        ),
        cost_estimate=cost,
    )(x, w1, b1, w_out, b_out)

    return slab, dim, n_actions


if __name__ == "__main__":
    # Module-consistent shapes: two attention modules each emitting a d_att=16
    # feature, Actor dim=32, n_actions=8; B=128 stacked timesteps/environments.
    d_att = 16
    n_att = 2
    d_in = d_att * n_att
    dim = 32
    n_actions = 8
    B = 128

    key = jax.random.PRNGKey(0)
    k_a0, k_a1, k_w1, k_b1, k_w2, k_b2 = jax.random.split(key, 6)

    att_feats = [
        jax.random.normal(k_a0, (B, d_att), dtype=jnp.float32),
        jax.random.normal(k_a1, (B, d_att), dtype=jnp.float32),
    ]
    # Deterministic synthetic parameter init (no checkpoint load).
    w1 = jax.random.normal(k_w1, (d_in, dim), dtype=jnp.float32) * 0.1
    b1 = jax.random.normal(k_b1, (1, dim), dtype=jnp.float32) * 0.1
    w2 = jax.random.normal(k_w2, (dim, n_actions), dtype=jnp.float32) * 0.1
    b2 = jax.random.normal(k_b2, (1, n_actions), dtype=jnp.float32) * 0.1

    slab, dim_out, na_out = policy_forward(att_feats, w1, b1, w2, b2)
    jax.block_until_ready(slab)

    # Unpack only for the correctness check (downstream code should consume
    # the packed slab directly).
    ft = slab[:, :dim_out]
    scores = slab[:, dim_out:dim_out + na_out]

    # Reference check in plain JAX (same semantics as the original module).
    x_ref = jnp.concatenate(att_feats, axis=-1)
    ft_ref = jnp.tanh(x_ref @ w1 + b1)
    scores_ref = ft_ref @ w2 + b2
    assert ft.shape == (B, dim) and scores.shape == (B, n_actions)
    assert jnp.allclose(ft, ft_ref, atol=1e-5)
    assert jnp.allclose(scores, scores_ref, atol=1e-5)
    # Padding lanes must be exactly zero.
    assert jnp.all(slab[:, dim + n_actions:] == 0.0)

    print("KERNEL_OK")
</pallas_src>

<mosaic_0001>
module attributes {stable_mosaic.version = 11 : i64} {
  func.func @_policy_kernel(%arg0: i32, %arg1: memref<128x32xf32, #tpu.memory_space<vmem>>, %arg2: memref<32x32xf32, #tpu.memory_space<vmem>>, %arg3: memref<1x32xf32, #tpu.memory_space<vmem>>, %arg4: memref<32x128xf32, #tpu.memory_space<vmem>>, %arg5: memref<1x128xf32, #tpu.memory_space<vmem>>, %arg6: memref<128x128xf32, #tpu.memory_space<vmem>>) attributes {dimension_semantics = [#tpu.dimension_semantics<arbitrary>], iteration_bounds = array<i64: 1>, scalar_prefetch = 0 : i64, scratch_operands = 0 : i64, tpu.core_type = #tpu.core_type<tc>, window_params = [{pipeline_mode = #tpu.pipeline_mode<synchronous>, transform_indices = @transform_0, window_bounds = array<i64: 128, 32>}, {pipeline_mode = #tpu.pipeline_mode<synchronous>, transform_indices = @transform_1, window_bounds = array<i64: 32, 32>}, {pipeline_mode = #tpu.pipeline_mode<synchronous>, transform_indices = @transform_2, window_bounds = array<i64: 1, 32>}, {pipeline_mode = #tpu.pipeline_mode<synchronous>, transform_indices = @transform_3, window_bounds = array<i64: 32, 128>}, {pipeline_mode = #tpu.pipeline_mode<synchronous>, transform_indices = @transform_4, window_bounds = array<i64: 1, 128>}, {pipeline_mode = #tpu.pipeline_mode<synchronous>, transform_indices = @transform_5, window_bounds = array<i64: 128, 128>}]} {
    %c0 = arith.constant 0 : index
    %c0_0 = arith.constant 0 : index
    %0 = vector.load %arg1[%c0, %c0_0] : memref<128x32xf32, #tpu.memory_space<vmem>>, vector<128x32xf32>
    %c0_1 = arith.constant 0 : index
    %c0_2 = arith.constant 0 : index
    %1 = vector.load %arg2[%c0_1, %c0_2] : memref<32x32xf32, #tpu.memory_space<vmem>>, vector<32x32xf32>
    %cst = arith.constant dense<0.000000e+00> : vector<128x32xf32>
    %2 = tpu.matmul %0, %1, %cst {dimension_numbers = #tpu.dot_dimension_numbers<[1], [0], [0], [1], [0, 0, 1, 1], [], []>} : vector<128x32xf32>, vector<32x32xf32>, vector<128x32xf32> -> vector<128x32xf32>
    %c0_3 = arith.constant 0 : index
    %c0_4 = arith.constant 0 : index
    %3 = vector.load %arg3[%c0_3, %c0_4] : memref<1x32xf32, #tpu.memory_space<vmem>>, vector<1x32xf32>
    %4 = vector.broadcast %3 : vector<1x32xf32> to vector<128x32xf32>
    %5 = arith.addf %2, %4 : vector<128x32xf32>
    %6 = math.tanh %5 : vector<128x32xf32>
    %c0_5 = arith.constant 0 : index
    %c0_6 = arith.constant 0 : index
    %7 = vector.load %arg4[%c0_5, %c0_6] : memref<32x128xf32, #tpu.memory_space<vmem>>, vector<32x128xf32>
    %cst_7 = arith.constant dense<0.000000e+00> : vector<128x128xf32>
    %8 = tpu.matmul %6, %7, %cst_7 {dimension_numbers = #tpu.dot_dimension_numbers<[1], [0], [0], [1], [0, 0, 1, 1], [], []>} : vector<128x32xf32>, vector<32x128xf32>, vector<128x128xf32> -> vector<128x128xf32>
    %c0_8 = arith.constant 0 : index
    %c0_9 = arith.constant 0 : index
    %9 = vector.load %arg5[%c0_8, %c0_9] : memref<1x128xf32, #tpu.memory_space<vmem>>, vector<1x128xf32>
    %10 = vector.broadcast %9 : vector<1x128xf32> to vector<128x128xf32>
    %11 = arith.addf %8, %10 : vector<128x128xf32>
    %c0_10 = arith.constant 0 : index
    %c0_11 = arith.constant 0 : index
    %12 = vector.load %arg6[%c0_10, %c0_11] : memref<128x128xf32, #tpu.memory_space<vmem>>, vector<128x128xf32>
    tpu.vector_store %arg6[%c0_10, %c0_11], %11 {strides = array<i32>} : memref<128x128xf32, #tpu.memory_space<vmem>>, vector<128x128xf32>,
    return
  }
  func.func @transform_0(%arg0: i32) -> (i32, i32) {
    %c0_i32 = arith.constant 0 : i32
    %c0_i32_0 = arith.constant 0 : i32
    %c0_i32_1 = arith.constant 0 : i32
    return %c0_i32, %c0_i32_0 : i32, i32
  }
  func.func @transform_1(%arg0: i32) -> (i32, i32) {
    %c0_i32 = arith.constant 0 : i32
    %c0_i32_0 = arith.constant 0 : i32
    %c0_i32_1 = arith.constant 0 : i32
    return %c0_i32, %c0_i32_0 : i32, i32
  }
  func.func @transform_2(%arg0: i32) -> (i32, i32) {
    %c0_i32 = arith.constant 0 : i32
    %c0_i32_0 = arith.constant 0 : i32
    %c0_i32_1 = arith.constant 0 : i32
    return %c0_i32, %c0_i32_0 : i32, i32
  }
  func.func @transform_3(%arg0: i32) -> (i32, i32) {
    %c0_i32 = arith.constant 0 : i32
    %c0_i32_0 = arith.constant 0 : i32
    %c0_i32_1 = arith.constant 0 : i32
    return %c0_i32, %c0_i32_0 : i32, i32
  }
  func.func @transform_4(%arg0: i32) -> (i32, i32) {
    %c0_i32 = arith.constant 0 : i32
    %c0_i32_0 = arith.constant 0 : i32
    %c0_i32_1 = arith.constant 0 : i32
    return %c0_i32, %c0_i32_0 : i32, i32
  }
  func.func @transform_5(%arg0: i32) -> (i32, i32) {
    %c0_i32 = arith.constant 0 : i32
    %c0_i32_0 = arith.constant 0 : i32
    %c0_i32_1 = arith.constant 0 : i32
    return %c0_i32, %c0_i32_0 : i32, i32
  }
}

</mosaic_0001>

<bundles_post_ra>
// kernel: tpu_custom_call.1
= control target key start
LH: loop header
LB: loop body
LE: loop exit
PB: predicated region body
PF: predicated region fallthrough
CT: control target
= control target key end

     0   :  { %s597_s0 = inlined_call_operand.vmem [shape: f32[128,32], index: 0, kind: input, shape index: {}]   ;;  %s598_s1 = inlined_call_operand.vmem [shape: f32[32,32], index: 1, kind: input, shape index: {}]   ;;  %s599_s2 = inlined_call_operand.vmem [shape: f32[1,32], index: 2, kind: input, shape index: {}]   ;;  %s600_s3 = inlined_call_operand.vmem [shape: f32[32,128], index: 3, kind: input, shape index: {}]   ;;  %s601_s4 = inlined_call_operand.vmem [shape: f32[1,128], index: 4, kind: input, shape index: {}]   ;;  %s602_s5 = inlined_call_operand.hbm [shape: f32[128,128], index: 5, kind: output, shape index: {}]  }
   0x1   :  { %v40_v0 = vld [vmem:[%s598_s1 + $0x18] sm:$0xff]  ;;  %v39_v1 = vld [vmem:[%s598_s1 + $0x10] sm:$0xff]  ;;  %v38_v2 = vld [vmem:[%s598_s1 + $0x8] sm:$0xff] }
   0x2   :  { %362 = vmatpush.msra.mxu2 %v40_v0  ;;  %106 = vmatpush.msra.mxu0 %v40_v0  ;;  %v37_v3 = vld [vmem:[%s598_s1] sm:$0xff] }
   0x4   :  { %363 = vmatpush.msra.mxu2 %v39_v1  ;;  %107 = vmatpush.msra.mxu0 %v39_v1 }
   0x5   :  { %10 = vsyncpa [#allocation3], 0  ;;  %v29_v4 = vld [vmem:[%s597_s0 + $0x40] sm:$0xff]  ;;  %vm45_vm0 = vcmask 261120   ;;  %v30_v6 = vld [vmem:[%s597_s0 + $0x48] sm:$0xff]  ;;  %s318_s18 = sshll.u32 %s602_s5, 4  ;;  %s319_s18 = int_to_ptr.hbm [resolvable:$true] %s318_s18 }
   0x6   :  { %364 = vmatpush.msra.mxu2 %v38_v2  ;;  %108 = vmatpush.msra.mxu0 %v38_v2  ;;  %v21_v5 = vld [vmem:[%s597_s0] sm:$0xff]  ;;  %v22_v7 = vld [vmem:[%s597_s0 + $0x8] sm:$0xff]  ;;  %v31_v8 = vld [vmem:[%s597_s0 + $0x50] sm:$0xff]  ;;  %s434_s19 = smov 128   ;;  %s435_s20 = smov 8  }
   0x7   :  { %v23_v9 = vld [vmem:[%s597_s0 + $0x10] sm:$0xff]  ;;  %v32_v10 = vld [vmem:[%s597_s0 + $0x58] sm:$0xff]  ;;  %v33_v12 = vld [vmem:[%s597_s0 + $0x60] sm:$0xff] }
   0x8   :  { %365 = vmatpush.msra.mxu2 %v37_v3  ;;  %109 = vmatpush.msra.mxu0 %v37_v3  ;;  %v24_v11 = vld [vmem:[%s597_s0 + $0x18] sm:$0xff]  ;;  %v25_v13 = vld [vmem:[%s597_s0 + $0x20] sm:$0xff]  ;;  %v34_v14 = vld [vmem:[%s597_s0 + $0x68] sm:$0xff] }
   0x9   :  { %338 = vmatmul.msk.f32.vlgmr.msra.gmra.mxu2 %vm45_vm0, %v29_v4  ;;  %330 = vmatmul.msk.f32.vlgmr.msra.gmra.mxu0 %vm45_vm0, %v21_v5  ;;  %v26_v15 = vld [vmem:[%s597_s0 + $0x28] sm:$0xff]  ;;  %v35_v16 = vld [vmem:[%s597_s0 + $0x70] sm:$0xff]  ;;  %v36_v18 = vld [vmem:[%s597_s0 + $0x78] sm:$0xff] }
   0xa   :  { %v27_v17 = vld [vmem:[%s597_s0 + $0x30] sm:$0xff]  ;;  %v28_v19 = vld [vmem:[%s597_s0 + $0x38] sm:$0xff]  ;;  %v176_v22 = vld [vmem:[%s600_s3 + $0x8] sm:$0xff] }
   0xb   :  { %v178_v20 = vld [vmem:[%s600_s3 + $0x18] sm:$0xff]  ;;  %v177_v21 = vld [vmem:[%s600_s3 + $0x10] sm:$0xff]  ;;  %v175_v23 = vld [vmem:[%s600_s3] sm:$0xff] }
   0xc   :  { %366 = vmatpush.msra.mxu3 %v178_v20  ;;  %243 = vmatpush.msra.mxu1 %v178_v20  ;;  %v557_v24 = vld [vmem:[%s599_s2] ss:$0 sm:$0xff] }
   0xe   :  { %367 = vmatpush.msra.mxu3 %v177_v21  ;;  %244 = vmatpush.msra.mxu1 %v177_v21 }
  0x10   :  { %368 = vmatpush.msra.mxu3 %v176_v22  ;;  %245 = vmatpush.msra.mxu1 %v176_v22 }
  0x11   :  { %339 = vmatmul.msk.f32.gmra.mxu2 %vm45_vm0, %v30_v6  ;;  %331 = vmatmul.msk.f32.gmra.mxu0 %vm45_vm0, %v22_v7 }
  0x12   :  { %369 = vmatpush.msra.mxu3 %v175_v23  ;;  %246 = vmatpush.msra.mxu1 %v175_v23 }
  0x19   :  { %340 = vmatmul.msk.f32.gmra.mxu2 %vm45_vm0, %v31_v8  ;;  %332 = vmatmul.msk.f32.gmra.mxu0 %vm45_vm0, %v23_v9  ;;  %v374_v9 = vld [vmem:[%s601_s4] ss:$0 sm:$0xff]  ;;  %s433_s4 = smov [#allocation2]  }
  0x1a   :  { %s316_s15 = sshll.u32 %s433_s4, 4  ;;  %s317_s15 = int_to_ptr.vmem [resolvable:$true] %s316_s15 }
  0x21   :  { %341 = vmatmul.msk.f32.gmra.mxu2 %vm45_vm0, %v32_v10  ;;  %333 = vmatmul.msk.f32.gmra.mxu0 %vm45_vm0, %v24_v11 }
  0x29   :  { %342 = vmatmul.msk.f32.gmra.mxu2 %vm45_vm0, %v33_v12  ;;  %334 = vmatmul.msk.f32.gmra.mxu0 %vm45_vm0, %v25_v13 }
  0x31   :  { %343 = vmatmul.msk.f32.gmra.mxu2 %vm45_vm0, %v34_v14  ;;  %335 = vmatmul.msk.f32.gmra.mxu0 %vm45_vm0, %v26_v15 }
  0x39   :  { %344 = vmatmul.msk.f32.gmra.mxu2 %vm45_vm0, %v35_v16  ;;  %336 = vmatmul.msk.f32.gmra.mxu0 %vm45_vm0, %v27_v17 }
  0x41   :  { %345 = vmatmul.msk.f32.gmra.mxu2 %vm45_vm0, %v36_v18  ;;  %337 = vmatmul.msk.f32.gmra.mxu0 %vm45_vm0, %v28_v19 }
  0x86   :  { %v111_v25 = vpop.f32.mrf.mxu0 }
  0x87   :  { %v112_v26 = vadd.f32 %v557_v24, %v111_v25 }
  0x89   :  { %375 = vtanh.f32 %v112_v26 }
  0x8c   :  { %v135_v27 = vpop.f32.mrf.mxu2 }
  0x8d   :  { %v136_v28 = vadd.f32 %v557_v24, %v135_v27 }
  0x8e   :  { %v114_v29 = vpop.f32.mrf.mxu0 }
  0x8f   :  { %v376_v30 = vpop.eup %375  ;;  %377 = vtanh.f32 %v136_v28  ;;  %v115_v31 = vadd.f32 %v557_v24, %v114_v29 }
  0x90   :  { %346 = vmatmul.msk.f32.vlgmr.msra.gmra.mxu1 %vm45_vm0, %v376_v30 }
  0x91   :  { %379 = vtanh.f32 %v115_v31 }
  0x94   :  { %v138_v32 = vpop.f32.mrf.mxu2 }
  0x95   :  { %v378_v33 = vpop.eup %377  ;;  %v139_v34 = vadd.f32 %v557_v24, %v138_v32 }
  0x96   :  { %354 = vmatmul.msk.f32.vlgmr.msra.gmra.mxu3 %vm45_vm0, %v378_v33  ;;  %v117_v35 = vpop.f32.mrf.mxu0 }
  0x97   :  { %v380_v36 = vpop.eup %379  ;;  %381 = vtanh.f32 %v139_v34  ;;  %v118_v37 = vadd.f32 %v557_v24, %v117_v35 }
  0x98   :  { %347 = vmatmul.msk.f32.gmra.mxu1 %vm45_vm0, %v380_v36 }
  0x99   :  { %383 = vtanh.f32 %v118_v37 }
  0x9c   :  { %v141_v38 = vpop.f32.mrf.mxu2 }
  0x9d   :  { %v382_v39 = vpop.eup %381  ;;  %v142_v40 = vadd.f32 %v557_v24, %v141_v38 }
  0x9e   :  { %355 = vmatmul.msk.f32.gmra.mxu3 %vm45_vm0, %v382_v39  ;;  %v120_v41 = vpop.f32.mrf.mxu0 }
  0x9f   :  { %v384_v42 = vpop.eup %383  ;;  %385 = vtanh.f32 %v142_v40  ;;  %v121_v43 = vadd.f32 %v557_v24, %v120_v41 }
  0xa0   :  { %348 = vmatmul.msk.f32.gmra.mxu1 %vm45_vm0, %v384_v42 }
  0xa1   :  { %387 = vtanh.f32 %v121_v43 }
  0xa4   :  { %v144_v44 = vpop.f32.mrf.mxu2 }
  0xa5   :  { %v386_v45 = vpop.eup %385  ;;  %v145_v46 = vadd.f32 %v557_v24, %v144_v44 }
  0xa6   :  { %356 = vmatmul.msk.f32.gmra.mxu3 %vm45_vm0, %v386_v45  ;;  %v123_v47 = vpop.f32.mrf.mxu0 }
  0xa7   :  { %v388_v48 = vpop.eup %387  ;;  %389 = vtanh.f32 %v145_v46  ;;  %v124_v49 = vadd.f32 %v557_v24, %v123_v47 }
  0xa8   :  { %349 = vmatmul.msk.f32.gmra.mxu1 %vm45_vm0, %v388_v48 }
  0xa9   :  { %391 = vtanh.f32 %v124_v49 }
  0xac   :  { %v147_v50 = vpop.f32.mrf.mxu2 }
  0xad   :  { %v390_v51 = vpop.eup %389  ;;  %v148_v52 = vadd.f32 %v557_v24, %v147_v50 }
  0xae   :  { %357 = vmatmul.msk.f32.gmra.mxu3 %vm45_vm0, %v390_v51  ;;  %v126_v53 = vpop.f32.mrf.mxu0 }
  0xaf   :  { %v392_v54 = vpop.eup %391  ;;  %393 = vtanh.f32 %v148_v52  ;;  %v127_v55 = vadd.f32 %v557_v24, %v126_v53 }
  0xb0   :  { %350 = vmatmul.msk.f32.gmra.mxu1 %vm45_vm0, %v392_v54 }
  0xb1   :  { %395 = vtanh.f32 %v127_v55 }
  0xb4   :  { %v150_v56 = vpop.f32.mrf.mxu2 }
  0xb5   :  { %v394_v57 = vpop.eup %393  ;;  %v151_v58 = vadd.f32 %v557_v24, %v150_v56 }
  0xb6   :  { %358 = vmatmul.msk.f32.gmra.mxu3 %vm45_vm0, %v394_v57  ;;  %v129_v59 = vpop.f32.mrf.mxu0 }
  0xb7   :  { %v396_v60 = vpop.eup %395  ;;  %397 = vtanh.f32 %v151_v58  ;;  %v130_v61 = vadd.f32 %v557_v24, %v129_v59 }
  0xb8   :  { %351 = vmatmul.msk.f32.gmra.mxu1 %vm45_vm0, %v396_v60 }
  0xb9   :  { %399 = vtanh.f32 %v130_v61 }
  0xbc   :  { %v153_v62 = vpop.f32.mrf.mxu2 }
  0xbd   :  { %v398_v63 = vpop.eup %397  ;;  %v154_v0 = vadd.f32 %v557_v24, %v153_v62 }
  0xbe   :  { %359 = vmatmul.msk.f32.gmra.mxu3 %vm45_vm0, %v398_v63  ;;  %v132_v1 = vpop.f32.mrf.mxu0 }
  0xbf   :  { %v400_v2 = vpop.eup %399  ;;  %401 = vtanh.f32 %v154_v0  ;;  %v133_v3 = vadd.f32 %v557_v24, %v132_v1 }
  0xc0   :  { %352 = vmatmul.msk.f32.gmra.mxu1 %vm45_vm0, %v400_v2 }
  0xc1   :  { %403 = vtanh.f32 %v133_v3 }
  0xc4   :  { %v156_v4 = vpop.f32.mrf.mxu2 }
  0xc5   :  { %v402_v5 = vpop.eup %401  ;;  %v157_v6 = vadd.f32 %v557_v24, %v156_v4 }
  0xc6   :  { %360 = vmatmul.msk.f32.gmra.mxu3 %vm45_vm0, %v402_v5 }
  0xc7   :  { %v404_v7 = vpop.eup %403  ;;  %405 = vtanh.f32 %v157_v6 }
  0xc8   :  { %353 = vmatmul.msk.f32.gmra.mxu1 %vm45_vm0, %v404_v7 }
  0xcd   :  { %v406_v8 = vpop.eup %405 }
  0xce   :  { %361 = vmatmul.msk.f32.gmra.mxu3 %vm45_vm0, %v406_v8 }
 0x10d   :  { %v248_v10 = vpop.f32.mrf.mxu1 }
 0x10e   :  { %v249_v11 = vadd.f32 %v374_v9, %v248_v10 }
 0x110   :  { %296 = vst [vmem:[#allocation2] sm:$0xff] %v249_v11 }
 0x115   :  { %v251_v12 = vpop.f32.mrf.mxu1 }
 0x116   :  { %v252_v13 = vadd.f32 %v374_v9, %v251_v12 }
 0x118   :  { %297 = vst [vmem:[#allocation2 + $0x8] sm:$0xff] %v252_v13 }
 0x119   :  { %v272_v14 = vpop.f32.mrf.mxu3 }
 0x11a   :  { %v273_v15 = vadd.f32 %v374_v9, %v272_v14 }
 0x11c   :  { %304 = vst [vmem:[#allocation2 + $0x40] sm:$0xff] %v273_v15 }
 0x11d   :  { %v254_v16 = vpop.f32.mrf.mxu1 }
 0x11e   :  { %v255_v17 = vadd.f32 %v374_v9, %v254_v16 }
 0x120   :  { %298 = vst [vmem:[#allocation2 + $0x10] sm:$0xff] %v255_v17 }
 0x121   :  { %v275_v18 = vpop.f32.mrf.mxu3 }
 0x122   :  { %v276_v19 = vadd.f32 %v374_v9, %v275_v18 }
 0x124   :  { %305 = vst [vmem:[#allocation2 + $0x48] sm:$0xff] %v276_v19 }
 0x125   :  { %v257_v20 = vpop.f32.mrf.mxu1 }
 0x126   :  { %v258_v21 = vadd.f32 %v374_v9, %v257_v20 }
 0x128   :  { %299 = vst [vmem:[#allocation2 + $0x18] sm:$0xff] %v258_v21 }
 0x129   :  { %v278_v22 = vpop.f32.mrf.mxu3 }
 0x12a   :  { %v279_v23 = vadd.f32 %v374_v9, %v278_v22 }
 0x12c   :  { %306 = vst [vmem:[#allocation2 + $0x50] sm:$0xff] %v279_v23 }
 0x12d   :  { %v260_v24 = vpop.f32.mrf.mxu1 }
 0x12e   :  { %v261_v25 = vadd.f32 %v374_v9, %v260_v24 }
 0x130   :  { %300 = vst [vmem:[#allocation2 + $0x20] sm:$0xff] %v261_v25 }
 0x131   :  { %v281_v26 = vpop.f32.mrf.mxu3 }
 0x132   :  { %v282_v27 = vadd.f32 %v374_v9, %v281_v26 }
 0x134   :  { %307 = vst [vmem:[#allocation2 + $0x58] sm:$0xff] %v282_v27 }
 0x135   :  { %v263_v28 = vpop.f32.mrf.mxu1 }
 0x136   :  { %v264_v29 = vadd.f32 %v374_v9, %v263_v28 }
 0x138   :  { %301 = vst [vmem:[#allocation2 + $0x28] sm:$0xff] %v264_v29 }
 0x139   :  { %v284_v30 = vpop.f32.mrf.mxu3 }
 0x13a   :  { %v285_v31 = vadd.f32 %v374_v9, %v284_v30 }
 0x13c   :  { %308 = vst [vmem:[#allocation2 + $0x60] sm:$0xff] %v285_v31 }
 0x13d   :  { %v266_v32 = vpop.f32.mrf.mxu1 }
 0x13e   :  { %v267_v33 = vadd.f32 %v374_v9, %v266_v32 }
 0x140   :  { %302 = vst [vmem:[#allocation2 + $0x30] sm:$0xff] %v267_v33 }
 0x141   :  { %v287_v34 = vpop.f32.mrf.mxu3 }
 0x142   :  { %v288_v35 = vadd.f32 %v374_v9, %v287_v34 }
 0x144   :  { %309 = vst [vmem:[#allocation2 + $0x68] sm:$0xff] %v288_v35 }
 0x145   :  { %v269_v36 = vpop.f32.mrf.mxu1 }
 0x146   :  { %v270_v37 = vadd.f32 %v374_v9, %v269_v36 }
 0x148   :  { %303 = vst [vmem:[#allocation2 + $0x38] sm:$0xff] %v270_v37 }
 0x149   :  { %v290_v38 = vpop.f32.mrf.mxu3 }
 0x14a   :  { %v291_v39 = vadd.f32 %v374_v9, %v290_v38 }
 0x14c   :  { %310 = vst [vmem:[#allocation2 + $0x70] sm:$0xff] %v291_v39 }
 0x151   :  { %v293_v40 = vpop.f32.mrf.mxu3 }
 0x152   :  { %v294_v41 = vadd.f32 %v374_v9, %v293_v40 }
 0x154   :  { %311 = vst [vmem:[#allocation2 + $0x78] sm:$0xff] %v294_v41 }
 0x155   :  { %324 = dma.vmem_to_hbm [thread:$0]  %s317_s15, 2048, %s319_s18, [#allocation3], %s434_s19, %s434_s19, %s435_s20  }
 0x156   :  { %431 = dma.done.wait [#allocation3], 2048  }
 0x157   :  { %432 = vsyncadd [#allocation3], 4294965248 }
 0x158   :  { %329 = vsyncpa [#allocation3], 1 }

</bundles_post_ra>
